<compile_context>
chip_gen: v6e
topology: v6e:2x2x1
jax: 0.10.0
libtpu: 0.0.40
codegen_flags: <defaults>
</compile_context>

<pallas_src>
import functools

import jax
import jax.numpy as jnp
from jax.experimental import pallas as pl
from jax.experimental.pallas import tpu as pltpu


def _leaky_relu(x, slope=0.2):
    return jnp.where(x >= 0, x, slope * x)


def _resstack_kernel(x_ref, halo_ref, w1l_ref, w1c_ref, w1r_ref, b1_ref,
                     w2_ref, ws_ref, b2s_ref, o_ref, *, dil):
    # x_ref:    (C, TT)    raw input tile (this batch element / time tile)
    # halo_ref: (C, 2*d)   [left halo | right halo] of the reflection-padded
    #                      signal for this tile (raw, pre-activation)
    # w1{l,c,r}_ref: (C, C)  dilated-conv taps for a[t-d], a[t], a[t+d]
    # b1_ref:   (C, 1)     f32
    # w2_ref:   (C, C)     second k=1 conv
    # ws_ref:   (C, C)     shortcut k=1 conv
    # b2s_ref:  (C, 1)     b2 + bs, f32
    # o_ref:    (C, TT)
    d = dil
    x = x_ref[...]                         # raw x (needed by the shortcut)
    TT = x.shape[1]

    # LeakyReLU(0.2) on the streamed tile + halo (elementwise, commutes with
    # the reflection padding done in glue).
    a = _leaky_relu(x)
    ah = _leaky_relu(halo_ref[...])

    # Shifted tap views with the reflection halo spliced in at the tile edges.
    # These are matmul operands and must be materialized either way; the
    # splice only touches d lanes per tap.
    tap_l = jnp.concatenate([ah[:, :d], a[:, :TT - d]], axis=1)   # a[t-d]
    tap_r = jnp.concatenate([a[:, d:], ah[:, d:]], axis=1)        # a[t+d]

    # Dilated k=3 conv as three back-to-back accumulating MXU dots (f32 acc);
    # no (3C, TT) stacked operand is ever built.
    h = jnp.dot(w1c_ref[...], a, preferred_element_type=jnp.float32)
    h += jnp.dot(w1l_ref[...], tap_l, preferred_element_type=jnp.float32)
    h += jnp.dot(w1r_ref[...], tap_r, preferred_element_type=jnp.float32)
    h = _leaky_relu(h + b1_ref[...])                              # f32 (C, TT)

    # Second k=1 conv + shortcut k=1 conv as two dots reading x directly from
    # its resident VMEM tile (no (2C, TT) concat).
    out = jnp.dot(w2_ref[...], h.astype(x.dtype),
                  preferred_element_type=jnp.float32)
    out += jnp.dot(ws_ref[...], x, preferred_element_type=jnp.float32)
    o_ref[...] = (out + b2s_ref[...]).astype(o_ref.dtype)


def _weight_norm(v, g):
    # PyTorch weight_norm on Conv1d: w = g * v / ||v||, norm over dims (1, 2)
    # per output channel; g has shape (C_out, 1, 1).
    norm = jnp.sqrt(jnp.sum(v * v, axis=(1, 2), keepdims=True))
    return g * v / norm


def _vmem_capacity_bytes():
    """Per-core VMEM capacity; conservative v7x fallback if unqueryable."""
    try:
        return int(pltpu.get_tpu_info().vmem_capacity_bytes)
    except Exception:
        return 64 * (1 << 20)


def _choose_time_tile(C, T, d, itemsize, vmem_budget_bytes):
    """Largest multiple-of-128 divisor of T that fits the planning budget;
    clamps to the smallest legal tile (never silently to T) if nothing fits.
    Full-slab fallback only for tiny / irregular T (e.g. unit tests)."""
    if T % 128 != 0:
        return T
    candidates = [tt for tt in range(128, T + 1, 128)
                  if T % tt == 0 and tt > d]
    if not candidates:
        return T
    best = None
    for tt in candidates:
        # double-buffered streamed x/out tiles
        io_bytes = (4 * C * tt) * itemsize
        # in-kernel temporaries: a, tap_l, tap_r, h_cast (streaming dtype)
        # + h, out (f32).  (The old 3C/2C concat operands are gone.)
        tmp_bytes = (4 * C * tt) * itemsize + (2 * C * tt) * 4
        # resident weights/biases (double-buffered by BlockSpec)
        w_bytes = (10 * C * C + 4 * C) * itemsize
        if io_bytes + tmp_bytes + w_bytes <= vmem_budget_bytes:
            best = tt
    if best is None:
        best = candidates[0]     # clamp rather than blow the VMEM limit
    return best


def resstack_forward(x, params, dilation, *, time_tile=None):
    """x: (B, C, T). Returns (B, C, T) in x.dtype.

    Pass a bf16 x to stream activations/weights in bf16 (MXU accumulation and
    biases stay f32) — roughly halves HBM traffic in the memory-bound regime.
    """
    B, C, T = x.shape
    d = int(dilation)
    assert 0 < d < T, "reflection padding requires 0 < dilation < T"
    dt = x.dtype

    # ---- glue: weight-norm reparam, per-tap / per-branch weight layouts -----
    w1 = _weight_norm(params["v1"], params["g1"])              # (C, C, 3)
    w2 = _weight_norm(params["v2"], params["g2"])[:, :, 0]     # (C, C)
    ws = _weight_norm(params["vs"], params["gs"])[:, :, 0]     # (C, C)
    # Conv1d is cross-correlation: tap k reads apad[t + k*d] = a[t + (k-1)*d],
    # so tap 0 pairs with a[t-d], tap 1 with a[t], tap 2 with a[t+d].
    w1l = w1[:, :, 0].astype(dt)
    w1c = w1[:, :, 1].astype(dt)
    w1r = w1[:, :, 2].astype(dt)
    w2 = w2.astype(dt)
    ws = ws.astype(dt)
    b1 = params["b1"].reshape(C, 1).astype(jnp.float32)
    b2s = (params["b2"] + params["bs"]).reshape(C, 1).astype(jnp.float32)

    # ---- generation-aware tile / VMEM budgets --------------------------------
    vmem_cap = _vmem_capacity_bytes()                      # 64 MiB v7x, 128 MiB v5e/v6e
    tile_budget = max(8 * (1 << 20), (vmem_cap * 3) // 10)
    vmem_limit = min((vmem_cap * 3) // 4, 112 * (1 << 20))

    if time_tile is None:
        TT = _choose_time_tile(C, T, d, jnp.dtype(dt).itemsize, tile_budget)
    else:
        TT = int(time_tile)
    assert T % TT == 0 and TT > d, (T, TT, d)
    nT = T // TT

    # ---- halos: one vectorized gather from the reflection-padded signal -----
    xpad = jnp.pad(x, ((0, 0), (0, 0), (d, d)), mode="reflect")  # (B, C, T+2d)
    starts = jnp.arange(nT) * TT
    offs = jnp.arange(d)
    idx = jnp.concatenate([starts[:, None] + offs[None, :],            # left
                           starts[:, None] + (TT + d) + offs[None, :]  # right
                           ], axis=1)                                  # (nT, 2d)
    halos = jnp.transpose(jnp.take(xpad, idx, axis=2), (0, 2, 1, 3))   # (B,nT,C,2d)

    grid = (B, nT)
    const = lambda b, j: (0, 0)
    out = pl.pallas_call(
        functools.partial(_resstack_kernel, dil=d),
        out_shape=jax.ShapeDtypeStruct((B, C, T), dt),
        grid_spec=pltpu.PrefetchScalarGridSpec(
            num_scalar_prefetch=0,
            grid=grid,
            in_specs=[
                pl.BlockSpec((pl.Squeezed(), C, TT),
                             lambda b, j: (b, 0, j)),                  # x tile
                pl.BlockSpec((pl.Squeezed(), pl.Squeezed(), C, 2 * d),
                             lambda b, j: (b, j, 0, 0)),               # halo
                pl.BlockSpec((C, C), const),                           # w1 tap L
                pl.BlockSpec((C, C), const),                           # w1 tap C
                pl.BlockSpec((C, C), const),                           # w1 tap R
                pl.BlockSpec((C, 1), const),                           # b1
                pl.BlockSpec((C, C), const),                           # w2
                pl.BlockSpec((C, C), const),                           # ws
                pl.BlockSpec((C, 1), const),                           # b2+bs
            ],
            out_specs=pl.BlockSpec((pl.Squeezed(), C, TT),
                                   lambda b, j: (b, 0, j)),
        ),
        compiler_params=pltpu.CompilerParams(
            dimension_semantics=("parallel", "parallel"),
            vmem_limit_bytes=int(vmem_limit)),
    )(x, halos, w1l, w1c, w1r, b1, w2, ws, b2s)
    return out


def _reference_forward(x, params, dilation):
    """Pure-JAX f32 reference for sanity checking."""
    d = dilation
    w1 = _weight_norm(params["v1"], params["g1"])
    w2 = _weight_norm(params["v2"], params["g2"])[:, :, 0]
    ws = _weight_norm(params["vs"], params["gs"])[:, :, 0]
    b1, b2, bs = params["b1"], params["b2"], params["bs"]

    a = _leaky_relu(x)
    apad = jnp.pad(a, ((0, 0), (0, 0), (d, d)), mode="reflect")
    T = x.shape[2]
    h = (jnp.einsum("oc,bct->bot", w1[:, :, 0], apad[:, :, 0:T])
         + jnp.einsum("oc,bct->bot", w1[:, :, 1], apad[:, :, d:d + T])
         + jnp.einsum("oc,bct->bot", w1[:, :, 2], apad[:, :, 2 * d:2 * d + T])
         + b1[None, :, None])
    h = _leaky_relu(h)
    blk = jnp.einsum("oc,bct->bot", w2, h) + b2[None, :, None]
    sc = jnp.einsum("oc,bct->bot", ws, x) + bs[None, :, None]
    return sc + blk


def make_params(key, channel):
    ks = jax.random.split(key, 9)
    C = channel
    return {
        "v1": jax.random.normal(ks[0], (C, C, 3), jnp.float32) * 0.3,
        "g1": jax.random.uniform(ks[1], (C, 1, 1), jnp.float32, 0.5, 1.5),
        "b1": jax.random.normal(ks[2], (C,), jnp.float32) * 0.1,
        "v2": jax.random.normal(ks[3], (C, C, 1), jnp.float32) * 0.3,
        "g2": jax.random.uniform(ks[4], (C, 1, 1), jnp.float32, 0.5, 1.5),
        "b2": jax.random.normal(ks[5], (C,), jnp.float32) * 0.1,
        "vs": jax.random.normal(ks[6], (C, C, 1), jnp.float32) * 0.3,
        "gs": jax.random.uniform(ks[7], (C, 1, 1), jnp.float32, 0.5, 1.5),
        "bs": jax.random.normal(ks[8], (C,), jnp.float32) * 0.1,
    }


if __name__ == "__main__":
    key = jax.random.PRNGKey(0)
    k_x, k_p, k_x2, k_p2, k_x3, k_p3 = jax.random.split(key, 6)

    # 1) Primary small check (single time tile path), f32.
    B, C, T, dilation = 2, 4, 16, 1
    x = jax.random.normal(k_x, (B, C, T), jnp.float32)
    params = make_params(k_p, C)
    out = jax.block_until_ready(resstack_forward(x, params, dilation))
    ref = _reference_forward(x, params, dilation)
    assert out.shape == (B, C, T)
    assert jnp.allclose(out, ref, atol=1e-4, rtol=1e-4)

    # 2) Time-tiled (multi-tile + halo) path, f32.
    B2, C2, T2, d2 = 1, 8, 256, 3
    x2 = jax.random.normal(k_x2, (B2, C2, T2), jnp.float32)
    params2 = make_params(k_p2, C2)
    out2 = jax.block_until_ready(
        resstack_forward(x2, params2, d2, time_tile=128))
    ref2 = _reference_forward(x2, params2, d2)
    assert out2.shape == (B2, C2, T2)
    assert jnp.allclose(out2, ref2, atol=1e-4, rtol=1e-4)

    # 3) MXU-sized channels with bf16 activation streaming (f32 accumulation);
    #    loose tolerance documents the deliberate bf16 precision drop.
    B3, C3, T3, d3 = 1, 128, 512, 3
    x3 = jax.random.normal(k_x3, (B3, C3, T3), jnp.float32).astype(jnp.bfloat16)
    params3 = make_params(k_p3, C3)
    out3 = jax.block_until_ready(resstack_forward(x3, params3, d3))
    ref3 = _reference_forward(x3.astype(jnp.float32), params3, d3)
    assert out3.dtype == jnp.bfloat16 and out3.shape == (B3, C3, T3)
    max_err = jnp.max(jnp.abs(out3.astype(jnp.float32) - ref3))
    assert float(max_err) < 0.25, float(max_err)

    print("KERNEL_OK")
</pallas_src>

<mosaic_0001>
module attributes {stable_mosaic.version = 11 : i64} {
  func.func @_resstack_kernel(%arg0: i32, %arg1: i32, %arg2: memref<1x4x16xf32, #tpu.memory_space<vmem>>, %arg3: memref<1x1x4x2xf32, #tpu.memory_space<vmem>>, %arg4: memref<4x4xf32, #tpu.memory_space<vmem>>, %arg5: memref<4x4xf32, #tpu.memory_space<vmem>>, %arg6: memref<4x4xf32, #tpu.memory_space<vmem>>, %arg7: memref<4x1xf32, #tpu.memory_space<vmem>>, %arg8: memref<4x4xf32, #tpu.memory_space<vmem>>, %arg9: memref<4x4xf32, #tpu.memory_space<vmem>>, %arg10: memref<4x1xf32, #tpu.memory_space<vmem>>, %arg11: memref<1x4x16xf32, #tpu.memory_space<vmem>>) attributes {dimension_semantics = [#tpu.dimension_semantics<parallel>, #tpu.dimension_semantics<parallel>], iteration_bounds = array<i64: 2, 1>, scalar_prefetch = 0 : i64, scratch_operands = 0 : i64, tpu.core_type = #tpu.core_type<tc>, window_params = [{transform_indices = @transform_0, window_bounds = array<i64: 1, 4, 16>}, {transform_indices = @transform_1, window_bounds = array<i64: 1, 1, 4, 2>}, {pipeline_mode = #tpu.pipeline_mode<synchronous>, transform_indices = @transform_2, window_bounds = array<i64: 4, 4>}, {pipeline_mode = #tpu.pipeline_mode<synchronous>, transform_indices = @transform_3, window_bounds = array<i64: 4, 4>}, {pipeline_mode = #tpu.pipeline_mode<synchronous>, transform_indices = @transform_4, window_bounds = array<i64: 4, 4>}, {pipeline_mode = #tpu.pipeline_mode<synchronous>, transform_indices = @transform_5, window_bounds = array<i64: 4, 1>}, {pipeline_mode = #tpu.pipeline_mode<synchronous>, transform_indices = @transform_6, window_bounds = array<i64: 4, 4>}, {pipeline_mode = #tpu.pipeline_mode<synchronous>, transform_indices = @transform_7, window_bounds = array<i64: 4, 4>}, {pipeline_mode = #tpu.pipeline_mode<synchronous>, transform_indices = @transform_8, window_bounds = array<i64: 4, 1>}, {transform_indices = @transform_9, window_bounds = array<i64: 1, 4, 16>}]} {
    %c0 = arith.constant 0 : index
    %c0_0 = arith.constant 0 : index
    %c0_1 = arith.constant 0 : index
    %0 = vector.load %arg2[%c0, %c0_0, %c0_1] : memref<1x4x16xf32, #tpu.memory_space<vmem>>, vector<1x4x16xf32>
    %1 = vector.shape_cast %0 : vector<1x4x16xf32> to vector<4x16xf32>
    %cst = arith.constant 0.000000e+00 : f32
    %2 = vector.broadcast %cst : f32 to vector<4x16xf32>
    %3 = arith.cmpf oge, %1, %2 : vector<4x16xf32>
    %cst_2 = arith.constant 2.000000e-01 : f32
    %4 = vector.broadcast %cst_2 : f32 to vector<4x16xf32>
    %5 = arith.mulf %4, %1 : vector<4x16xf32>
    %6 = arith.select %3, %1, %5 : vector<4x16xi1>, vector<4x16xf32>
    %c0_3 = arith.constant 0 : index
    %c0_4 = arith.constant 0 : index
    %c0_5 = arith.constant 0 : index
    %c0_6 = arith.constant 0 : index
    %7 = vector.load %arg3[%c0_3, %c0_4, %c0_5, %c0_6] : memref<1x1x4x2xf32, #tpu.memory_space<vmem>>, vector<1x1x4x2xf32>
    %8 = vector.shape_cast %7 : vector<1x1x4x2xf32> to vector<4x2xf32>
    %cst_7 = arith.constant 0.000000e+00 : f32
    %9 = vector.broadcast %cst_7 : f32 to vector<4x2xf32>
    %10 = arith.cmpf oge, %8, %9 : vector<4x2xf32>
    %cst_8 = arith.constant 2.000000e-01 : f32
    %11 = vector.broadcast %cst_8 : f32 to vector<4x2xf32>
    %12 = arith.mulf %11, %8 : vector<4x2xf32>
    %13 = arith.select %10, %8, %12 : vector<4x2xi1>, vector<4x2xf32>
    %14 = vector.extract_strided_slice %13 {offsets = [0, 0], sizes = [4, 1], strides = [1, 1]} : vector<4x2xf32> to vector<4x1xf32>
    %15 = vector.extract_strided_slice %6 {offsets = [0, 0], sizes = [4, 15], strides = [1, 1]} : vector<4x16xf32> to vector<4x15xf32>
    %16 = tpu.concatenate %14, %15 in 1 : vector<4x1xf32>, vector<4x15xf32> -> vector<4x16xf32>
    %17 = vector.extract_strided_slice %6 {offsets = [0, 1], sizes = [4, 15], strides = [1, 1]} : vector<4x16xf32> to vector<4x15xf32>
    %18 = vector.extract_strided_slice %13 {offsets = [0, 1], sizes = [4, 1], strides = [1, 1]} : vector<4x2xf32> to vector<4x1xf32>
    %19 = tpu.concatenate %17, %18 in 1 : vector<4x15xf32>, vector<4x1xf32> -> vector<4x16xf32>
    %c0_9 = arith.constant 0 : index
    %c0_10 = arith.constant 0 : index
    %20 = vector.load %arg5[%c0_9, %c0_10] : memref<4x4xf32, #tpu.memory_space<vmem>>, vector<4x4xf32>
    %cst_11 = arith.constant dense<0.000000e+00> : vector<4x16xf32>
    %21 = tpu.matmul %20, %6, %cst_11 {dimension_numbers = #tpu.dot_dimension_numbers<[1], [0], [0], [1], [0, 0, 1, 1], [], []>} : vector<4x4xf32>, vector<4x16xf32>, vector<4x16xf32> -> vector<4x16xf32>
    %c0_12 = arith.constant 0 : index
    %c0_13 = arith.constant 0 : index
    %22 = vector.load %arg4[%c0_12, %c0_13] : memref<4x4xf32, #tpu.memory_space<vmem>>, vector<4x4xf32>
    %cst_14 = arith.constant dense<0.000000e+00> : vector<4x16xf32>
    %23 = tpu.matmul %22, %16, %cst_14 {dimension_numbers = #tpu.dot_dimension_numbers<[1], [0], [0], [1], [0, 0, 1, 1], [], []>} : vector<4x4xf32>, vector<4x16xf32>, vector<4x16xf32> -> vector<4x16xf32>
    %24 = arith.addf %21, %23 : vector<4x16xf32>
    %c0_15 = arith.constant 0 : index
    %c0_16 = arith.constant 0 : index
    %25 = vector.load %arg6[%c0_15, %c0_16] : memref<4x4xf32, #tpu.memory_space<vmem>>, vector<4x4xf32>
    %cst_17 = arith.constant dense<0.000000e+00> : vector<4x16xf32>
    %26 = tpu.matmul %25, %19, %cst_17 {dimension_numbers = #tpu.dot_dimension_numbers<[1], [0], [0], [1], [0, 0, 1, 1], [], []>} : vector<4x4xf32>, vector<4x16xf32>, vector<4x16xf32> -> vector<4x16xf32>
    %27 = arith.addf %24, %26 : vector<4x16xf32>
    %c0_18 = arith.constant 0 : index
    %c0_19 = arith.constant 0 : index
    %28 = vector.load %arg7[%c0_18, %c0_19] : memref<4x1xf32, #tpu.memory_space<vmem>>, vector<4x1xf32>
    %29 = vector.broadcast %28 : vector<4x1xf32> to vector<4x16xf32>
    %30 = arith.addf %27, %29 : vector<4x16xf32>
    %cst_20 = arith.constant 0.000000e+00 : f32
    %31 = vector.broadcast %cst_20 : f32 to vector<4x16xf32>
    %32 = arith.cmpf oge, %30, %31 : vector<4x16xf32>
    %cst_21 = arith.constant 2.000000e-01 : f32
    %33 = vector.broadcast %cst_21 : f32 to vector<4x16xf32>
    %34 = arith.mulf %33, %30 : vector<4x16xf32>
    %35 = arith.select %32, %30, %34 : vector<4x16xi1>, vector<4x16xf32>
    %c0_22 = arith.constant 0 : index
    %c0_23 = arith.constant 0 : index
    %36 = vector.load %arg8[%c0_22, %c0_23] : memref<4x4xf32, #tpu.memory_space<vmem>>, vector<4x4xf32>
    %cst_24 = arith.constant dense<0.000000e+00> : vector<4x16xf32>
    %37 = tpu.matmul %36, %35, %cst_24 {dimension_numbers = #tpu.dot_dimension_numbers<[1], [0], [0], [1], [0, 0, 1, 1], [], []>} : vector<4x4xf32>, vector<4x16xf32>, vector<4x16xf32> -> vector<4x16xf32>
    %c0_25 = arith.constant 0 : index
    %c0_26 = arith.constant 0 : index
    %38 = vector.load %arg9[%c0_25, %c0_26] : memref<4x4xf32, #tpu.memory_space<vmem>>, vector<4x4xf32>
    %cst_27 = arith.constant dense<0.000000e+00> : vector<4x16xf32>
    %39 = tpu.matmul %38, %1, %cst_27 {dimension_numbers = #tpu.dot_dimension_numbers<[1], [0], [0], [1], [0, 0, 1, 1], [], []>} : vector<4x4xf32>, vector<4x16xf32>, vector<4x16xf32> -> vector<4x16xf32>
    %40 = arith.addf %37, %39 : vector<4x16xf32>
    %c0_28 = arith.constant 0 : index
    %c0_29 = arith.constant 0 : index
    %41 = vector.load %arg10[%c0_28, %c0_29] : memref<4x1xf32, #tpu.memory_space<vmem>>, vector<4x1xf32>
    %42 = vector.broadcast %41 : vector<4x1xf32> to vector<4x16xf32>
    %43 = arith.addf %40, %42 : vector<4x16xf32>
    %c0_30 = arith.constant 0 : index
    %c0_31 = arith.constant 0 : index
    %c0_32 = arith.constant 0 : index
    %44 = vector.load %arg11[%c0_30, %c0_31, %c0_32] : memref<1x4x16xf32, #tpu.memory_space<vmem>>, vector<1x4x16xf32>
    %45 = vector.shape_cast %44 : vector<1x4x16xf32> to vector<4x16xf32>
    %46 = vector.shape_cast %43 : vector<4x16xf32> to vector<1x4x16xf32>
    tpu.vector_store %arg11[%c0_30, %c0_31, %c0_32], %46 {strides = array<i32>} : memref<1x4x16xf32, #tpu.memory_space<vmem>>, vector<1x4x16xf32>,
    return
  }
  func.func @transform_0(%arg0: i32, %arg1: i32) -> (i32, i32, i32) {
    %c0_i32 = arith.constant 0 : i32
    %c0_i32_0 = arith.constant 0 : i32
    return %arg0, %c0_i32, %arg1 : i32, i32, i32
  }
  func.func @transform_1(%arg0: i32, %arg1: i32) -> (i32, i32, i32, i32) {
    %c0_i32 = arith.constant 0 : i32
    %c0_i32_0 = arith.constant 0 : i32
    %c0_i32_1 = arith.constant 0 : i32
    return %arg0, %arg1, %c0_i32, %c0_i32_0 : i32, i32, i32, i32
  }
  func.func @transform_2(%arg0: i32, %arg1: i32) -> (i32, i32) {
    %c0_i32 = arith.constant 0 : i32
    %c0_i32_0 = arith.constant 0 : i32
    %c0_i32_1 = arith.constant 0 : i32
    return %c0_i32, %c0_i32_0 : i32, i32
  }
  func.func @transform_3(%arg0: i32, %arg1: i32) -> (i32, i32) {
    %c0_i32 = arith.constant 0 : i32
    %c0_i32_0 = arith.constant 0 : i32
    %c0_i32_1 = arith.constant 0 : i32
    return %c0_i32, %c0_i32_0 : i32, i32
  }
  func.func @transform_4(%arg0: i32, %arg1: i32) -> (i32, i32) {
    %c0_i32 = arith.constant 0 : i32
    %c0_i32_0 = arith.constant 0 : i32
    %c0_i32_1 = arith.constant 0 : i32
    return %c0_i32, %c0_i32_0 : i32, i32
  }
  func.func @transform_5(%arg0: i32, %arg1: i32) -> (i32, i32) {
    %c0_i32 = arith.constant 0 : i32
    %c0_i32_0 = arith.constant 0 : i32
    %c0_i32_1 = arith.constant 0 : i32
    return %c0_i32, %c0_i32_0 : i32, i32
  }
  func.func @transform_6(%arg0: i32, %arg1: i32) -> (i32, i32) {
    %c0_i32 = arith.constant 0 : i32
    %c0_i32_0 = arith.constant 0 : i32
    %c0_i32_1 = arith.constant 0 : i32
    return %c0_i32, %c0_i32_0 : i32, i32
  }
  func.func @transform_7(%arg0: i32, %arg1: i32) -> (i32, i32) {
    %c0_i32 = arith.constant 0 : i32
    %c0_i32_0 = arith.constant 0 : i32
    %c0_i32_1 = arith.constant 0 : i32
    return %c0_i32, %c0_i32_0 : i32, i32
  }
  func.func @transform_8(%arg0: i32, %arg1: i32) -> (i32, i32) {
    %c0_i32 = arith.constant 0 : i32
    %c0_i32_0 = arith.constant 0 : i32
    %c0_i32_1 = arith.constant 0 : i32
    return %c0_i32, %c0_i32_0 : i32, i32
  }
  func.func @transform_9(%arg0: i32, %arg1: i32) -> (i32, i32, i32) {
    %c0_i32 = arith.constant 0 : i32
    %c0_i32_0 = arith.constant 0 : i32
    return %arg0, %c0_i32, %arg1 : i32, i32, i32
  }
}

</mosaic_0001>

<bundles_post_ra>
// kernel: tpu_custom_call.1
= control target key start
LH: loop header
LB: loop body
LE: loop exit
PB: predicated region body
PF: predicated region fallthrough
CT: control target
= control target key end

     0   :  { %s1304_s0 = inlined_call_operand.vmem [shape: f32[2,4,16], index: 0, kind: input, shape index: {}]   ;;  %s1305_s1 = inlined_call_operand.vmem [shape: f32[2,1,4,2], index: 1, kind: input, shape index: {}]   ;;  %s1306_s2 = inlined_call_operand.vmem [shape: f32[4,4], index: 2, kind: input, shape index: {}]   ;;  %s1307_s3 = inlined_call_operand.vmem [shape: f32[4,4], index: 3, kind: input, shape index: {}]   ;;  %s1308_s4 = inlined_call_operand.vmem [shape: f32[4,4], index: 4, kind: input, shape index: {}]   ;;  %s1309_s5 = inlined_call_operand.vmem [shape: f32[4,1], index: 5, kind: input, shape index: {}]   ;;  %s1310_s6 = inlined_call_operand.vmem [shape: f32[4,4], index: 6, kind: input, shape index: {}]   ;;  %s1311_s7 = inlined_call_operand.vmem [shape: f32[4,4], index: 7, kind: input, shape index: {}]   ;;  %s1312_s8 = inlined_call_operand.vmem [shape: f32[4,1], index: 8, kind: input, shape index: {}]   ;;  %s1313_s9 = inlined_call_operand.hbm [shape: f32[2,4,16], index: 9, kind: output, shape index: {}]  }
   0x1   :  { %1314 = sst [smem:[#allocation5_spill]] %s1304_s0 }
   0x2   :  { %14 = vsyncpa [#allocation3], 0 }
   0x3   :  { %16 = vsyncpa [#allocation3 + $0x1], 0  ;;  %s1166_s30 = smov 0   ;;  %s1168_s10 = smov 0  }
   0x4   :  { %s1170_s11 = smov 0   ;;  %s1172_s12 = smov 0  }
   0x5   :  { %s1174_s13 = smov 0   ;;  %s1176_s14 = smov 0  }
   0x6 LB: > { %s911_s15 = sadd.s32 4294967295, %s1107_s14   ;;  %s912_s16 = sadd.s32 4294967294, %s1107_s14   ;;  %s1107_s14 = sphi %s1176_s14, %s22_s14   ;;  %s1103_s13 = sphi %s1174_s13, %s1322_s13   ;;  %s1099_s12 = sphi %s1172_s12, %s1321_s12   ;;  %s1095_s11 = sphi %s1170_s11, %s1320_s11   ;;  %s1091_s10 = sphi %s1168_s10, %s1319_s10   ;;  %s1087_s30 = sphi %s1166_s30, %s1318_s30  }
   0x7   : > { %s34_s17 = sadd.s32 1, %s1103_s13  ;;  %s246_s18 = sadd.s32 1, %s1095_s11 }
   0x8   : > { %p36_p0 = scmp.ge.s32.totalorder %s34_s17, 2  ;;  %p256_p1 = scmp.ne.s32.totalorder %s1095_s11, %s1091_s10 }
   0x9   : > { %p257_p2 = scmp.eq.s32.totalorder %s911_s15, 1  ;;  %p262_p3 = scmp.ne.s32.totalorder %s1091_s10, %s1087_s30 }
   0xa   : > { %s1324_s17 = smov (%p36_p0, %s34_s17), 0  ;;  %p263_p5 = scmp.eq.s32.totalorder %s912_s16, 1 }
   0xb   : > { %p1206_p4 = por %p257_p2, %p256_p1  ;;  %s241_s20 = ssub.s32 %s1103_s13, %s1324_s17 }
   0xc   : > { %p915_p6 = scmp.ge.s32.totalorder %s1107_s14, 1  ;;  %p244_p7 = scmp.eq.s32.totalorder %s241_s20, 0 }
   0xd   : > { %p1213_p8 = por %p263_p5, %p262_p3  ;;  %p322_p9 = scmp.lt.s32.totalorder %s1107_s14, 3 }
   0xe   : > { %s1219_s22 = scalar_select %p244_p7, %s1095_s11, %s246_s18  }
   0xf   : > { %p323_p10 = pnand %p915_p6, %p322_p9 }
  0x10   : > { %p367_p11 = scmp.lt.s32.totalorder (!%p323_p10), %s1099_s12, 1  ;;  %s1317_s0 = sld [smem:[#allocation5_spill]] (!%p323_p10) }
  0x11   : > { %326 = sbr.rel (%p323_p10) target bundleno = 562 (0x232), region = 56  ;;  %s1112_s20 = smov (!%p323_p10), 1  }
  0x12   : > { %s1114_s26 = smov (!%p323_p10), 127   ;;  %s930_s28 = sshll.u32 (!%p323_p10), %s1099_s12, 6 }
  0x13   : > { %s1115_s25 = smov (!%p323_p10), [#allocation2]  }
  0x16   : > { %v1109_v0 = vmov 0.0   ;;  %s368_s23 = scalar_select %p367_p11, %s1099_s12, 1  ;;  %vm1110_vm0 = vmmov 0   ;;  %v1111_v1 = vmov 0   ;;  %vm410_vm3 = vcmask 1043456  }
  0x17   : > { %943 = vmatprep.subr.mxu0 %v1109_v0  ;;  %948 = vmatprep.subr.mxu1 %v1109_v0  ;;  %vm406_vm4 = vcmask 31744   ;;  %v404_v8 = vld [vmem:[%s1307_s3] sm:$0xf]  ;;  %vm393_vm5 = vcmask 7168   ;;  %vm402_vm6 = vcmask 121856   ;;  %vm808_vm8 = vcmask 125952  }
  0x18   : > { %945 = vmatprep.mubr.msk.f32.mxu0 %vm1110_vm0, %v1109_v0  ;;  %950 = vmatprep.mubr.msk.f32.mxu1 %vm1110_vm0, %v1109_v0  ;;  %s917_s24 = sshll.u32 %s368_s23, 2  ;;  %s1113_s23 = smov 14   ;;  %v637_v9 = vld [vmem:[%s1309_s5] sm:$0xf] }
  0x19   : > { %1029 = vset.pattern.permute.xlu1 %v1111_v1  ;;  %1030 = vset.pattern.permute.xlu0 %v1111_v1  ;;  %s373_s27 = scalar_lea.vmem %s1317_s0, %s917_s24  ;;  %s380_s15 = scalar_lea.vmem %s1305_s1, %s917_s24  ;;  %v405_v11 = vld [vmem:[%s1306_s2] sm:$0xf] }
  0x1a   : > { %v381_v2 = vld [vmem:[%s373_s27] sm:$0xf]  ;;  %s1035_s12 = sshll.u32 %s1115_s25, 4  ;;  %s1036_s12 = int_to_ptr.vmem [resolvable:$false] %s1035_s12 }
  0x1b   : > { %v385_v3 = vld [vmem:[%s380_s15] sm:$0xf]  ;;  %vm382_vm1 = vcmp.ge.f32.partialorder %v381_v2, 0.0  ;;  %v383_v4 = vmul.f32 0.2, %v381_v2 }
  0x1c   : > { %vm386_vm2 = vcmp.ge.f32.partialorder %v385_v3, 0.0  ;;  %v387_v5 = vmul.f32 0.2, %v385_v3  ;;  %v559_v15 = vld [vmem:[%s1308_s4] sm:$0xf] }
  0x1d   : > { %v384_v6 = vsel %vm382_vm1, %v381_v2, %v383_v4  ;;  %v648_v17 = vld [vmem:[%s1311_s7] sm:$0xf] }
  0x1e   : > { %v388_v7 = vsel %vm386_vm2, %v385_v3, %v387_v5  ;;  %390 = vrot.lane.b32.xlu0 %v384_v6, %s1112_s20  ;;  %949 = vmatpush3.msk.msra.mxu1 %vm410_vm3, %v384_v6  ;;  %v801_v19 = vld [vmem:[%s1312_s8] sm:$0xf]  ;;  %s823_s20 = scalar_lea.hbm %s1313_s9, %s930_s28 }
  0x1f   : > { %399 = vrot.lane.b32.xlu1 %v388_v7, %s1113_s23  ;;  %951 = vmatmul.mubr.msk.f32.vlgmr.msra.gmra.mxu1 %vm406_vm4, %v404_v8  ;;  %v647_v30 = vld [vmem:[%s1310_s6] sm:$0xf] }
  0x20   : > { %958 = vmatprep.subr.mxu1 %v1109_v0  ;;  %960 = vmatprep.mubr.msk.f32.mxu1 %vm1110_vm0, %v1109_v0 }
  0x21   : > { %959 = vmatpush3.msk.msra.mxu1 %vm410_vm3, %v381_v2 }
  0x22   : > { %395 = vrot.lane.b32.xlu0 %v384_v6, %s1114_s26  ;;  %s364_s26 = sand.u32 1, %s1091_s10  }
  0x23   : > { %640 = vperm.xlu1 %1029, %v637_v9   ;;  %961 = vmatmul.mubr.msk.f32.vlgmr.msra.gmra.mxu1 %vm406_vm4, %v648_v17  ;;  %s916_s27 = sshll.u32 %s364_s26, 2  ;;  %s811_s23 = scalar_lea.sflag [#allocation3], %s364_s26 }
  0x24   : > { %s366_s29 = scalar_lea.vmem [#allocation2], %s916_s27  ;;  %s1037_s27 = scalar_lea.vmem %s1036_s12, 128 }
  0x25   : > { %s825_s15 = sshll.u32 %s366_s29, 4  ;;  %s826_s15 = int_to_ptr.vmem [resolvable:$true] %s825_s15 }
  0x26   : > { %804 = vperm.xlu0 %1030, %v801_v19   ;;  %s1031_s24 = scalar_lea.vmem %s826_s15, 64  ;;  %p1038_p1 = scmp.lt.s32.totalorder %s826_s15, %s1036_s12 }
  0x27   : > { %p1032_p12 = scmp.ne.s32.totalorder %s826_s15, %s1031_s24  ;;  %p1039_p2 = scmp.lt.s32.totalorder %s1037_s27, %s1031_s24 }
  0x29   : > { %p1033_p13 = pnand %p1032_p12, %p1206_p4  ;;  %p1040_p3 = por %p1039_p2, %p1038_p1 }
  0x2b   : > { %p1034_p0 = pneg %p1033_p13 }
  0x2d   : > { %p1041_p5 = pnand %p1040_p3, %p1034_p0 }
  0x90   : > { %v391_v10 = vpop.permute.xlu0 %390 }
  0x91   : > { %v394_v12 = vsel %vm393_vm5, %v388_v7, %v391_v10  ;;  %v400_v13 = vpop.permute.xlu1 %399 }
  0x92   : > { %944 = vmatpush3.msk.msra.mxu0 %vm410_vm3, %v394_v12 }
  0x93   : > { %946 = vmatmul.mubr.msk.f32.vlgmr.msra.gmra.mxu0 %vm406_vm4, %v405_v11  ;;  %953 = vmatprep.subr.mxu0 %v1109_v0 }
  0x94   : > { %v396_v14 = vpop.permute.xlu0 %395  ;;  %955 = vmatprep.mubr.msk.f32.mxu0 %vm1110_vm0, %v1109_v0 }
  0x95   : > { %v403_v16 = vsel %vm402_vm6, %v396_v14, %v400_v13 }
  0x96   : > { %954 = vmatpush3.msk.msra.mxu0 %vm410_vm3, %v403_v16 }
  0x97   : > { %956 = vmatmul.mubr.msk.f32.vlgmr.msra.gmra.mxu0 %vm406_vm4, %v559_v15  ;;  %963 = vmatprep.subr.mxu0 %v1109_v0 }
  0x98   : > { %965 = vmatprep.mubr.msk.f32.mxu0 %vm1110_vm0, %v1109_v0 }
  0x9e   : > { %v641_v25 = vpop.permute.xlu1 %640 }
  0xa1   : > { %v805_v35 = vpop.permute.xlu0 %804 }
  0xdf   : > { %v555_v18 = vpop.f32.mrf.mxu1 }
  0xe1   : > { %v952_v20 = vpop.f32.mrf.mxu1 }
  0xe3   : > { %v721_v32 = vpop.f32.mrf.mxu1 }
  0xe5   : > { %v962_v33 = vpop.f32.mrf.mxu1 }
 0x153   : > { %v480_v21 = vpop.f32.mrf.mxu0 }
 0x154   : > { %v556_v23 = vadd.f32 %v555_v18, %v480_v21 }
 0x155   : > { %v947_v22 = vpop.f32.mrf.mxu0 }
 0x157   : > { %v632_v24 = vpop.f32.mrf.mxu0 }
 0x158   : > { %v636_v26 = vadd.f32 %v632_v24, %v556_v23 }
 0x159   : > { %v957_v27 = vpop.f32.mrf.mxu0 }
 0x15a   : > { %v643_v28 = vadd.f32 %v641_v25, %v636_v26 }
 0x15c   : > { %vm644_vm7 = vcmp.ge.f32.partialorder %v643_v28, 0.0  ;;  %v645_v29 = vmul.f32 0.2, %v643_v28 }
 0x15e   : > { %v646_v31 = vsel %vm644_vm7, %v643_v28, %v645_v29 }
 0x15f   : > { %964 = vmatpush3.msk.msra.mxu0 %vm410_vm3, %v646_v31 }
 0x160   : > { %966 = vmatmul.mubr.msk.f32.vlgmr.msra.gmra.mxu0 %vm406_vm4, %v647_v30 }
 0x220   : > { %v797_v34 = vpop.f32.mrf.mxu0 }
 0x221   : > { %v798_v36 = vadd.f32 %v797_v34, %v721_v32 }
 0x222   : > { %v967_v37 = vpop.f32.mrf.mxu0 }
 0x223   : > { %v807_v38 = vadd.f32 %v805_v35, %v798_v36 }
 0x225   : > { %809 = vst.msk [vmem:[%s366_s29] sm:$0xf] %vm808_vm8, %v807_v38 }
 0x226   : > { %1044 = shalt.err (!%p1041_p5)
}
 0x227   : > { %s1045_s0 = scalar_lea.hbm %s823_s20, 64  ;;  %s1049_s29 = scalar_lea.hbm %s1313_s9, 128 }
 0x228   : > { %p1046_p6 = scmp.ne.s32.totalorder %s823_s20, %s1045_s0  ;;  %p1050_p10 = scmp.lt.s32.totalorder %s823_s20, %s1313_s9 }
 0x229   : > { %p1051_p11 = scmp.lt.s32.totalorder %s1049_s29, %s1045_s0 }
 0x22a   : > { %p1047_p7 = pnand %p1046_p6, %p1206_p4 }
 0x22b   : > { %p1052_p12 = por %p1051_p11, %p1050_p10 }
 0x22c   : > { %p1048_p9 = pneg %p1047_p7 }
 0x22e   : > { %p1053_p13 = pnand %p1052_p12, %p1048_p9 }
 0x230   : > { %1056 = shalt.err (!%p1053_p13)
}
 0x231   : > { %968 = dma.vmem_to_hbm [thread:$0]  (%p1206_p4), %s826_s15, 64, %s823_s20, %s811_s23  }
 0x232 PF: > { %p974_p0 = scmp.ge.s32.totalorder %s1107_s14, 2  ;;  %s837_s24 = sand.u32 1, %s1087_s30  }
 0x233   : > { %s838_s25 = scalar_lea.sflag [#allocation3], %s837_s24 }
 0x234   : > { %p971_p1 = pnand %p974_p0, %p1213_p8 }
 0x236   : > { %p972_p2 = pneg %p971_p1 }
 0x238   : > { %1082 = dma.done.wait (%p972_p2), %s838_s25, 64  }
 0x239   : > { %1084 = vsyncadd (%p972_p2), %s838_s25, 4294967232  ;;  %s22_s14 = sadd.s32 1, %s1107_s14   ;;  %s1318_s30 = smov %s1091_s10 }
 0x23a   : > { %p19_p3 = scmp.ge.s32.totalorder %s22_s14, 4   ;;  %s1319_s10 = smov %s1095_s11 }
 0x23b   : > { %s1320_s11 = smov %s1219_s22  ;;  %s1321_s12 = smov %s1103_s13 }
 0x23c   : > { %s1322_s13 = smov %s1324_s17  ;;  %21 = sbr.rel (!%p19_p3) target bundleno = 6 (0x6), region = 94 }
 0x241   :  { %843 = vsyncpa [#allocation3], 1 }
 0x242   :  { %845 = vsyncpa [#allocation3 + $0x1], 1 }

</bundles_post_ra>
